<compile_context>
chip_gen: v7x
topology: tpu7x:2x2x1
jax: 0.10.0
libtpu: 0.0.40
codegen_flags: <defaults>
</compile_context>

<pallas_src>
import functools
import math

import jax
import jax.numpy as jnp
from jax.experimental import pallas as pl
from jax.experimental.pallas import tpu as pltpu


# ---------------------------------------------------------------------------
# Pallas kernel: weighted accumulation of top_k circularly-shifted copies of
# the values block.  The circular shift by delay d is a contiguous window
# [d, d + L) into the time-doubled values buffer.
# ---------------------------------------------------------------------------
def _delay_agg_kernel(delay_ref, w_ref, vcat_ref, o_ref, *, top_k):
    # delay_ref: (B, top_k) int32 in SMEM  (scalar prefetch)
    # w_ref    : (B, top_k) f32   in SMEM  (scalar prefetch)
    # vcat_ref : (1, 2*Lp, tile_R) f32 in VMEM  -- time-doubled values [V; V]
    # o_ref    : (1, Lp,   tile_R) f32
    b = pl.program_id(0)
    l_out = o_ref.shape[1]
    acc = jnp.zeros(o_ref.shape[1:], jnp.float32)
    for i in range(top_k):                      # top_k ~ log(L): small, static
        d = delay_ref[b, i]                     # delay in [0, L)
        w = w_ref[b, i]
        # roll(V, -d, time)  ==  window [d, d + l_out) of the doubled buffer
        acc = acc + vcat_ref[0, pl.ds(d, l_out), :] * w
    o_ref[0] = acc.astype(o_ref.dtype)


def _round_up(x, m):
    return ((x + m - 1) // m) * m


def _pick_tile_r(rp, t_cat, l_out, batch):
    """Lane tile (multiple of 128) for the H*D dim: minimize padding waste,
    keep double-buffered f32 blocks under a VMEM budget, and keep >= 2 grid
    cells when batch == 1 so both TensorCores get work on v7x."""
    budget = 40 * 1024 * 1024
    cands = sorted({c for c in (rp, 512, 384, 256, 128) if c <= rp},
                   reverse=True)
    feasible = [c for c in cands
                if 2 * 4 * (t_cat + l_out) * c <= budget] or [128]
    tile_r = min(feasible, key=lambda c: ((-rp) % c, -c))
    if batch == 1 and -(-rp // tile_r) < 2 and rp >= 256:
        tile_r = _round_up(-(-rp // 2), 128)
    return tile_r


def _time_delay_agg(values_blr, delay, weights, L):
    """values_blr: (B, L, R) f32; delay: (B, top_k) int32; weights: (B, top_k)
    f32.  Returns (B, L, R) f32 = sum_i weights[b,i] * roll(V, -delay[b,i], 1)."""
    B, _, R = values_blr.shape
    top_k = delay.shape[1]

    l_out = _round_up(L, 8)          # output rows (f32 sublane tile)
    t_cat = 2 * l_out                # time-doubled (+padded) input rows
    rp = _round_up(R, 128)           # lane-dense H*D
    tile_r = _pick_tile_r(rp, t_cat, l_out, B)
    rp = _round_up(rp, tile_r)
    n_r = rp // tile_r

    # [V; V] along time so a circular shift becomes a contiguous window.
    vcat = jnp.concatenate([values_blr, values_blr], axis=1)        # (B, 2L, R)
    vcat = jnp.pad(vcat, ((0, 0), (0, t_cat - 2 * L), (0, rp - R)))

    # Explicit VMEM limit computed from the double-buffered block sizes.
    vmem_bytes = 2 * 4 * (t_cat + l_out) * tile_r + (4 << 20)
    vmem_bytes = int(min(max(vmem_bytes, 16 << 20), 64 << 20))

    out = pl.pallas_call(
        functools.partial(_delay_agg_kernel, top_k=top_k),
        out_shape=jax.ShapeDtypeStruct((B, l_out, rp), jnp.float32),
        grid_spec=pltpu.PrefetchScalarGridSpec(
            num_scalar_prefetch=2,
            grid=(B, n_r),
            in_specs=[
                pl.BlockSpec((1, t_cat, tile_r),
                             lambda b, r, d_ref, w_ref: (b, 0, r)),
            ],
            out_specs=pl.BlockSpec((1, l_out, tile_r),
                                   lambda b, r, d_ref, w_ref: (b, 0, r)),
        ),
        compiler_params=pltpu.CompilerParams(
            dimension_semantics=("parallel", "parallel"),
            vmem_limit_bytes=vmem_bytes),
    )(delay.astype(jnp.int32), weights.astype(jnp.float32), vcat)
    return out[:, :L, :R]


# ---------------------------------------------------------------------------
# Full AutoCorrelation forward (output_attention supported).
# ---------------------------------------------------------------------------
def auto_correlation(queries, keys, values, *, factor=1, training=True,
                     output_attention=False):
    """queries: (B, L, H, E), keys: (B, S, H, E), values: (B, S, H, D), f32.
    Returns (V, attn) with V: (B, L, H, D) — matches AutoCorrelation.forward."""
    B, L, H, E = queries.shape
    _, S, _, D = values.shape

    # ---- length alignment (same as the PyTorch forward) ----
    if L > S:
        values = jnp.concatenate(
            [values, jnp.zeros((B, L - S, H, D), values.dtype)], axis=1)
        keys = jnp.concatenate(
            [keys, jnp.zeros((B, L - S, H, E), keys.dtype)], axis=1)
    else:
        values = values[:, :L]
        keys = keys[:, :L]

    # ---- phase 1: period-based dependency discovery ----
    # TODO(synk): rfft/irfft has no Pallas TPU primitive; computed with jnp.fft.
    q_fft = jnp.fft.rfft(jnp.transpose(queries, (0, 2, 3, 1)), axis=-1)
    k_fft = jnp.fft.rfft(jnp.transpose(keys, (0, 2, 3, 1)), axis=-1)
    corr = jnp.fft.irfft(q_fft * jnp.conj(k_fft), n=L, axis=-1)      # (B,H,E,L)

    # ---- top-k delay selection + softmax weights (tiny; host/XLA) ----
    top_k = max(1, int(factor * math.log(L)))
    mean_value = jnp.mean(jnp.mean(corr, axis=1), axis=1)            # (B, L)
    if training:
        # Global delays (batch-averaged correlation), per-batch weights.
        index = jax.lax.top_k(jnp.mean(mean_value, axis=0), top_k)[1]
        weights = jnp.take(mean_value, index, axis=1)                # (B, top_k)
        delay = jnp.broadcast_to(index[None, :], (B, top_k))         # (B, top_k)
    else:
        weights, delay = jax.lax.top_k(mean_value, top_k)            # (B, top_k)
    tmp_corr = jax.nn.softmax(weights, axis=-1)                      # (B, top_k)

    # ---- phase 2 (heavy): time delay aggregation in the Pallas kernel ----
    # Values stay in (B, L, H*D) layout; the kernel output is already the
    # module's (B, L, H, D) result layout -> no transposes on either side.
    R = H * D
    v_blr = values.reshape(B, L, R).astype(jnp.float32)
    agg = _time_delay_agg(v_blr, delay, tmp_corr, L)                 # (B, L, R)
    V = agg.reshape(B, L, H, D)

    if output_attention:
        return V, jnp.transpose(corr, (0, 3, 1, 2))
    return V, None


# ---------------------------------------------------------------------------
# Pure-JAX reference mirroring the PyTorch module step by step.
# ---------------------------------------------------------------------------
def auto_correlation_ref(queries, keys, values, *, factor=1, training=True):
    B, L, H, E = queries.shape
    _, S, _, D = values.shape
    if L > S:
        values = jnp.concatenate(
            [values, jnp.zeros((B, L - S, H, D), values.dtype)], axis=1)
        keys = jnp.concatenate(
            [keys, jnp.zeros((B, L - S, H, E), keys.dtype)], axis=1)
    else:
        values = values[:, :L]
        keys = keys[:, :L]

    q_fft = jnp.fft.rfft(jnp.transpose(queries, (0, 2, 3, 1)), axis=-1)
    k_fft = jnp.fft.rfft(jnp.transpose(keys, (0, 2, 3, 1)), axis=-1)
    corr = jnp.fft.irfft(q_fft * jnp.conj(k_fft), n=L, axis=-1)      # (B,H,E,L)
    vals = jnp.transpose(values, (0, 2, 3, 1))                       # (B,H,D,L)

    top_k = max(1, int(factor * math.log(L)))
    mean_value = jnp.mean(jnp.mean(corr, axis=1), axis=1)            # (B, L)
    delays_agg = jnp.zeros_like(vals)
    if training:
        index = jax.lax.top_k(jnp.mean(mean_value, axis=0), top_k)[1]
        weights = jnp.stack([mean_value[:, index[i]] for i in range(top_k)],
                            axis=-1)
        w = jax.nn.softmax(weights, axis=-1)
        for i in range(top_k):
            pattern = jnp.roll(vals, -int(index[i]), axis=-1)        # eager only
            delays_agg = delays_agg + pattern * w[:, i][:, None, None, None]
    else:
        weights, delay = jax.lax.top_k(mean_value, top_k)
        w = jax.nn.softmax(weights, axis=-1)
        init_index = jnp.arange(L)[None, None, None, :]
        vals2 = jnp.concatenate([vals, vals], axis=-1)
        for i in range(top_k):
            tmp_delay = init_index + delay[:, i][:, None, None, None]
            pattern = jnp.take_along_axis(
                vals2, jnp.broadcast_to(tmp_delay, vals.shape), axis=-1)
            delays_agg = delays_agg + pattern * w[:, i][:, None, None, None]
    return jnp.transpose(delays_agg, (0, 3, 1, 2)), None


if __name__ == "__main__":
    B, L, H, E, D = 2, 16, 4, 8, 8

    key = jax.random.PRNGKey(0)
    kq, kk, kv = jax.random.split(key, 3)
    queries = jax.random.normal(kq, (B, L, H, E), dtype=jnp.float32)
    keys = jax.random.normal(kk, (B, L, H, E), dtype=jnp.float32)
    values = jax.random.normal(kv, (B, L, H, D), dtype=jnp.float32)

    # Training-mode aggregation (default nn.Module state).
    V, attn = auto_correlation(queries, keys, values, factor=1, training=True)
    V = jax.block_until_ready(V)
    V_ref, _ = auto_correlation_ref(queries, keys, values, factor=1,
                                    training=True)
    assert V.shape == (B, L, H, D)
    assert attn is None
    assert jnp.allclose(V, V_ref, atol=1e-3, rtol=1e-3)   # kernel is pure f32

    # Inference-mode aggregation goes through the same Pallas kernel.
    V_inf, _ = auto_correlation(queries, keys, values, factor=1, training=False)
    V_inf = jax.block_until_ready(V_inf)
    V_inf_ref, _ = auto_correlation_ref(queries, keys, values, factor=1,
                                        training=False)
    assert jnp.allclose(V_inf, V_inf_ref, atol=1e-3, rtol=1e-3)

    # output_attention branch.
    V_oa, corr_oa = auto_correlation(queries, keys, values, factor=1,
                                     training=True, output_attention=True)
    jax.block_until_ready(V_oa)
    assert corr_oa.shape == (B, L, H, E)

    print("KERNEL_OK")
</pallas_src>

<mosaic_0001>
module attributes {stable_mosaic.version = 11 : i64} {
  func.func @_delay_agg_kernel(%arg0: i32, %arg1: i32, %arg2: memref<2x2xi32, #tpu.memory_space<smem>>, %arg3: memref<2x2xf32, #tpu.memory_space<smem>>, %arg4: memref<1x32x128xf32, #tpu.memory_space<vmem>>, %arg5: memref<1x16x128xf32, #tpu.memory_space<vmem>>) attributes {dimension_semantics = [#tpu.dimension_semantics<parallel>, #tpu.dimension_semantics<parallel>], iteration_bounds = array<i64: 2, 1>, scalar_prefetch = 2 : i64, scratch_operands = 0 : i64, tpu.core_type = #tpu.core_type<tc>, window_params = [{transform_indices = @transform_0, window_bounds = array<i64: 1, 32, 128>}, {transform_indices = @transform_1, window_bounds = array<i64: 1, 16, 128>}]} {
    %cst = arith.constant 0.000000e+00 : f32
    %0 = vector.broadcast %cst : f32 to vector<16x128xf32>
    %1 = arith.index_cast %arg0 : i32 to index
    %c0 = arith.constant 0 : index
    %2 = memref.load %arg2[%1, %c0] : memref<2x2xi32, #tpu.memory_space<smem>>
    %3 = arith.index_cast %arg0 : i32 to index
    %c0_0 = arith.constant 0 : index
    %4 = memref.load %arg3[%3, %c0_0] : memref<2x2xf32, #tpu.memory_space<smem>>
    %c0_1 = arith.constant 0 : index
    %5 = arith.index_cast %2 : i32 to index
    %c0_2 = arith.constant 0 : index
    %6 = vector.load %arg4[%c0_1, %5, %c0_2] : memref<1x32x128xf32, #tpu.memory_space<vmem>>, vector<1x16x128xf32>
    %7 = vector.shape_cast %6 : vector<1x16x128xf32> to vector<16x128xf32>
    %8 = vector.broadcast %4 : f32 to vector<16x128xf32>
    %9 = arith.mulf %7, %8 : vector<16x128xf32>
    %10 = arith.addf %0, %9 : vector<16x128xf32>
    %11 = arith.index_cast %arg0 : i32 to index
    %c1 = arith.constant 1 : index
    %12 = memref.load %arg2[%11, %c1] : memref<2x2xi32, #tpu.memory_space<smem>>
    %13 = arith.index_cast %arg0 : i32 to index
    %c1_3 = arith.constant 1 : index
    %14 = memref.load %arg3[%13, %c1_3] : memref<2x2xf32, #tpu.memory_space<smem>>
    %c0_4 = arith.constant 0 : index
    %15 = arith.index_cast %12 : i32 to index
    %c0_5 = arith.constant 0 : index
    %16 = vector.load %arg4[%c0_4, %15, %c0_5] : memref<1x32x128xf32, #tpu.memory_space<vmem>>, vector<1x16x128xf32>
    %17 = vector.shape_cast %16 : vector<1x16x128xf32> to vector<16x128xf32>
    %18 = vector.broadcast %14 : f32 to vector<16x128xf32>
    %19 = arith.mulf %17, %18 : vector<16x128xf32>
    %20 = arith.addf %10, %19 : vector<16x128xf32>
    %c0_6 = arith.constant 0 : index
    %c0_7 = arith.constant 0 : index
    %c0_8 = arith.constant 0 : index
    %21 = vector.load %arg5[%c0_6, %c0_7, %c0_8] : memref<1x16x128xf32, #tpu.memory_space<vmem>>, vector<1x16x128xf32>
    %22 = vector.shape_cast %21 : vector<1x16x128xf32> to vector<16x128xf32>
    %23 = vector.shape_cast %20 : vector<16x128xf32> to vector<1x16x128xf32>
    tpu.vector_store %arg5[%c0_6, %c0_7, %c0_8], %23 {strides = array<i32>} : memref<1x16x128xf32, #tpu.memory_space<vmem>>, vector<1x16x128xf32>,
    return
  }
  func.func @transform_0(%arg0: i32, %arg1: i32, %arg2: memref<2x2xi32, #tpu.memory_space<smem>>, %arg3: memref<2x2xf32, #tpu.memory_space<smem>>) -> (i32, i32, i32) {
    %c0_i32 = arith.constant 0 : i32
    %c0_i32_0 = arith.constant 0 : i32
    return %arg0, %c0_i32, %arg1 : i32, i32, i32
  }
  func.func @transform_1(%arg0: i32, %arg1: i32, %arg2: memref<2x2xi32, #tpu.memory_space<smem>>, %arg3: memref<2x2xf32, #tpu.memory_space<smem>>) -> (i32, i32, i32) {
    %c0_i32 = arith.constant 0 : i32
    %c0_i32_0 = arith.constant 0 : i32
    return %arg0, %c0_i32, %arg1 : i32, i32, i32
  }
}

</mosaic_0001>

<bundles_post_ra>
// kernel: tpu_custom_call.1
= control target key start
LH: loop header
LB: loop body
LE: loop exit
PB: predicated region body
PF: predicated region fallthrough
CT: control target
= control target key end

     0   :  { %s732_s0 = inlined_call_operand.hbm [shape: s32[2,2], index: 0, kind: input, shape index: {}]   ;;  %s733_s2 = inlined_call_operand.hbm [shape: f32[2,32,128], index: 2, kind: input, shape index: {}]   ;;  %s734_s3 = inlined_call_operand.hbm [shape: f32[2,16,128], index: 3, kind: output, shape index: {}]   ;;  %s735_s1 = inlined_call_operand.vmem [shape: f32[2,2], index: 1, kind: input, shape index: {}]  }
   0x1   :  { %s374_s14 = scalar_lea.hbm %s732_s0, 32 }
   0x2   :  { %p375_p0 = scmp.ne.s32.totalorder %s732_s0, %s374_s14  ;;  %p378_p1 = scmp.lt.u32.totalorder %s374_s14, %s732_s0 }
   0x4   :  { %p380_p2 = pnand %p378_p1, %p375_p0 }
   0x6   :  { %383 = shalt.err (!%p380_p2)  }
   0x7   :  { %s512_s19 = smov [#allocation3]   ;;  %s10_s24 = sshll.u32 %s735_s1, 4  ;;  %s11_s24 = int_to_ptr.vmem [resolvable:$true] %s10_s24 }
   0x8   :  { %9 = dma.hbm_to_smem %s732_s0, 32, %s512_s19, [#allocation2] }
   0x9   :  { %s384_s25 = scalar_lea.vmem %s11_s24, 32  ;;  %p389_p4 = scmp.lt.s32.totalorder %s11_s24, %s11_s24 }
   0xa   :  { %p385_p3 = scmp.ne.s32.totalorder %s11_s24, %s384_s25  ;;  %p390_p5 = scmp.lt.s32.totalorder %s384_s25, %s384_s25 }
   0xc   :  { %p391_p6 = por %p390_p5, %p389_p4 }
   0xe   :  { %p392_p7 = pnand %p391_p6, %p385_p3 }
  0x10   :  { %395 = shalt.err (!%p392_p7)  }
  0x11   :  { %s513_s26 = smov [#allocation4]  }
  0x12   :  { %13 = dma.vmem_to_smem %s11_s24, 32, %s513_s26, [#allocation2] }
  0x13   :  { %478 = dma.done.wait [#allocation2], 64 }
  0x14   :  { %479 = vsyncadd [#allocation2], 4294967232 }
  0x15   :  { %15 = sfence }
  0x16   :  { %16 = vsyncpa [#allocation6], 0 }
  0x17   :  { %18 = vsyncpa [#allocation6 + $0x1], 0 }
  0x18   :  { %19 = vsyncpa [#allocation7], 0 }
  0x19   :  { %21 = vsyncpa [#allocation7 + $0x1], 0  ;;  %s555_s0 = smov 0   ;;  %s557_s1 = smov 0  }
  0x1a   :  { %s559_s27 = smov 0   ;;  %s561_s28 = smov 0  }
  0x1b   :  { %s563_s29 = smov 0   ;;  %s565_s30 = smov 0  }
  0x1c LB: > { %s288_s4 = sadd.s32 4294967295, %s510_s30   ;;  %s289_s5 = sadd.s32 4294967294, %s510_s30   ;;  %s510_s30 = sphi %s565_s30, %s27_s30   ;;  %s506_s29 = sphi %s563_s29, %s750_s29   ;;  %s502_s28 = sphi %s561_s28, %s749_s28   ;;  %s498_s27 = sphi %s559_s27, %s748_s27   ;;  %s494_s1 = sphi %s557_s1, %s747_s1   ;;  %s490_s0 = sphi %s555_s0, %s746_s0  }
  0x1d   : > { %s39_s6 = sadd.s32 1, %s506_s29  ;;  %s48_s7 = sadd.s32 1, %s498_s27 }
  0x1e   : > { %p41_p8 = scmp.ge.s32.totalorder %s39_s6, 2  ;;  %p55_p9 = scmp.ne.s32.totalorder %s498_s27, %s494_s1 }
  0x1f   : > { %p56_p10 = scmp.eq.s32.totalorder %s510_s30, 0  ;;  %p61_p11 = scmp.ne.s32.totalorder %s494_s1, %s490_s0 }
  0x20   : > { %s752_s6 = smov (%p41_p8, %s39_s6), 0  ;;  %p62_p13 = scmp.eq.s32.totalorder %s288_s4, 0 }
  0x21   : > { %p596_p12 = por %p56_p10, %p55_p9  ;;  %s43_s9 = ssub.s32 %s506_s29, %s752_s6 }
  0x22   : > { %p87_p0 = scmp.eq.s32.totalorder %s288_s4, 1  ;;  %p46_p1 = scmp.eq.s32.totalorder %s43_s9, 0 }
  0x23   : > { %p602_p2 = por %p62_p13, %p61_p11  ;;  %p93_p4 = scmp.eq.s32.totalorder %s289_s5, 1 }
  0x24   : > { %p606_p3 = por %p87_p0, %p55_p9  ;;  %p318_p7 = scmp.lt.s32.totalorder %s510_s30, 2 }
  0x25   : > { %s611_s12 = scalar_select %p46_p1, %s498_s27, %s48_s7  }
  0x26   : > { %s739_s11 = scalar_select %p606_p3, 1, 0 }
  0x27   : > { %p613_p5 = por %p93_p4, %p61_p11  ;;  %s113_s14 = sand.u32 1, %s498_s27  }
  0x28   : > { %s292_s15 = sshll.u32 %s113_s14, 5  ;;  %s304_s16 = sshll.u32 %s506_s29, 9 }
  0x29   : > { %s740_s13 = scalar_select %p613_p5, 1, 0 }
  0x2a   : > { %s624_s19 = scalar_lea.hbm %s733_s2, %s304_s16  ;;  %s117_s20 = scalar_lea.vmem [#allocation5], %s292_s15 }
  0x2b   : > { %s125_s21 = sshll.u32 %s117_s20, 4  ;;  %p630_p8 = pnand %p318_p7, %p596_p12  ;;  %s626_s21 = int_to_ptr.vmem [resolvable:$true] %s125_s21 }
  0x2c   : > { %s635_s23 = scalar_lea.sflag [#allocation6], %s113_s14  ;;  %s396_s24 = scalar_lea.hbm %s624_s19, 512 }
  0x2d   : > { %p397_p10 = scmp.ne.s32.totalorder %s624_s19, %s396_s24  ;;  %p398_p11 = pneg %p630_p8 }
  0x2e   : > { %s401_s4 = scalar_lea.hbm %s733_s2, 1024  ;;  %p402_p12 = scmp.lt.u32.totalorder %s624_s19, %s733_s2 }
  0x2f   : > { %p399_p13 = pnand %p398_p11, %p397_p10  ;;  %p403_p1 = scmp.lt.u32.totalorder %s401_s4, %s396_s24 }
  0x30   : > { %p405_p7 = scmp.lt.u32.totalorder %s396_s24, %s624_s19 }
  0x31   : > { %p400_p0 = pneg %p399_p13  ;;  %p404_p4 = por %p403_p1, %p402_p12 }
  0x33   : > { %p406_p6 = por %p405_p7, %p404_p4 }
  0x35   : > { %p407_p9 = pnand %p406_p6, %p400_p0 }
  0x37   : > { %410 = shalt.err (!%p407_p9)
}
  0x38   : > { %s411_s8 = scalar_lea.vmem %s626_s21, 512  ;;  %s514_s9 = smov [#allocation5]  }
  0x39   : > { %p412_p10 = scmp.ne.s32.totalorder %s626_s21, %s411_s8  ;;  %s416_s14 = sshll.u32 %s514_s9, 4  ;;  %s417_s14 = int_to_ptr.vmem [resolvable:$false] %s416_s14 }
  0x3a   : > { %s418_s15 = scalar_lea.vmem %s417_s14, 1024  ;;  %p419_p3 = scmp.lt.s32.totalorder %s626_s21, %s417_s14 }
  0x3b   : > { %p414_p13 = pnand %p412_p10, %p398_p11  ;;  %p420_p12 = scmp.lt.s32.totalorder %s418_s15, %s411_s8 }
  0x3d   : > { %p415_p5 = pneg %p414_p13  ;;  %p421_p1 = por %p420_p12, %p419_p3 }
  0x3f   : > { %p422_p4 = pnand %p421_p1, %p415_p5 }
  0x41   : > { %425 = shalt.err (!%p422_p4)
}
  0x42   : > { %s515_s16 = smov 128   ;;  %s516_s17 = smov 8  }
  0x43   : > { %313 = dma.hbm_to_vmem [thread:$0]  (!%p630_p8), %s624_s19, 512, %s626_s21, %s635_s23, %s515_s16, %s515_s16, %s516_s17  }
  0x44   : > { %p133_p6 = scmp.lt.s32.totalorder %s510_s30, 3  ;;  %p742_p9 = scmp.ge.s32.totalorder %s510_s30, 1 }
  0x46   : > { %p134_p11 = pnand %p742_p9, %p133_p6 }
  0x47   : > { %s667_s18 = sand.u32 (!%p134_p11), 1, %s494_s1  }
  0x48   : > { %137 = sbr.rel (%p134_p11) target bundleno = 112 (0x70), region = 24  ;;  %s296_s20 = sshll.u32 (!%p134_p11), %s667_s18, 5 }
  0x49   : > { %s140_s24 = scalar_lea.sflag (!%p134_p11), [#allocation6], %s667_s18  ;;  %s143_s25 = scalar_lea.vmem (!%p134_p11), [#allocation5], %s296_s20 }
  0x4f   : > { %481 = dma.done.wait (%p602_p2), %s140_s24, 512  }
  0x50   : > { %483 = vsyncadd (%p602_p2), %s140_s24, 4294966784  ;;  %s298_s19 = sshll.u32 %s502_s28, 7  ;;  %s297_s21 = sshll.u32 %s667_s18, 4 }
  0x51   : > { %s163_s22 = sld [smem:[#allocation3 + %s298_s19]]  ;;  %s173_s26 = sadd.s32 1, %s298_s19 }
  0x52   : > { %s164_s23 = sld [smem:[#allocation4 + %s298_s19]]  ;;  %s161_s8 = scalar_lea.vmem [#allocation8], %s297_s21 }
  0x53   : > { %s174_s4 = sld [smem:[#allocation3 + %s173_s26]]  ;;  %s201_s9 = sshll.u32 %s161_s8, 4  ;;  %s678_s9 = int_to_ptr.vmem [resolvable:$true] %s201_s9 }
  0x54   : > { %s175_s5 = sld [smem:[#allocation4 + %s173_s26]]  ;;  %s305_s14 = sshll.u32 %s502_s28, 8 }
  0x55   : > { %s683_s17 = scalar_lea.hbm %s734_s3, %s305_s14  ;;  %s187_s20 = scalar_lea.sflag [#allocation7], %s667_s18 }
  0x56   : > { %s426_s28 = scalar_lea.vmem %s678_s9, 256  ;;  %p743_p3 = scmp.ne.s32.totalorder %s739_s11, 0 }
  0x57   : > { %s165_s7 = scalar_lea.vmem %s143_s25, %s163_s22 [#allocation5]  ;;  %p427_p2 = scmp.ne.s32.totalorder %s678_s9, %s426_s28 }
  0x58   : > { %v166_v0 = vld [vmem:[%s165_s7] sm:$0xff]  ;;  %v168_v1 = vstv %s164_s23  ;;  %v167_v2 = vld [vmem:[%s165_s7 + $0x8] sm:$0xff]  ;;  %s517_s24 = smov [#allocation8]  }
  0x59   : > { %v169_v3 = vmul.f32 %v168_v1, %v166_v0  ;;  %s176_s10 = scalar_lea.vmem %s143_s25, %s174_s4 [#allocation5]  ;;  %v170_v5 = vmul.f32 %v168_v1, %v167_v2  ;;  %p428_p5 = pnand %p427_p2, %p743_p3 }
  0x5a   : > { %v179_v4 = vstv %s175_s5  ;;  %v177_v6 = vld [vmem:[%s176_s10] sm:$0xff]  ;;  %v178_v7 = vld [vmem:[%s176_s10 + $0x8] sm:$0xff]  ;;  %s430_s25 = sshll.u32 %s517_s24, 4  ;;  %s431_s25 = int_to_ptr.vmem [resolvable:$false] %s430_s25 }
  0x5b   : > { %v180_v8 = vmul.f32 %v179_v4, %v177_v6  ;;  %v181_v9 = vmul.f32 %v179_v4, %v178_v7  ;;  %p429_p8 = pneg %p428_p5  ;;  %s432_s19 = scalar_lea.vmem %s431_s25, 512 }
  0x5c   : > { %p433_p0 = scmp.lt.s32.totalorder %s678_s9, %s431_s25  ;;  %p434_p7 = scmp.lt.s32.totalorder %s432_s19, %s426_s28 }
  0x5d   : > { %v182_v10 = vadd.f32 %v180_v8, %v169_v3  ;;  %v183_v11 = vadd.f32 %v181_v9, %v170_v5 }
  0x5e   : > { %p435_p10 = por %p434_p7, %p433_p0 }
  0x5f   : > { %184 = vst [vmem:[%s161_s8] sm:$0xff] %v182_v10  ;;  %185 = vst [vmem:[%s161_s8 + $0x8] sm:$0xff] %v183_v11 }
  0x60   : > { %p436_p13 = pnand %p435_p10, %p429_p8 }
  0x62   : > { %439 = shalt.err (!%p436_p13)
}
  0x63   : > { %s440_s21 = scalar_lea.hbm %s683_s17, 256  ;;  %s444_s26 = scalar_lea.hbm %s734_s3, 512 }
  0x64   : > { %p441_p12 = scmp.ne.s32.totalorder %s683_s17, %s440_s21  ;;  %p445_p6 = scmp.lt.u32.totalorder %s683_s17, %s734_s3 }
  0x65   : > { %p446_p9 = scmp.lt.u32.totalorder %s444_s26, %s440_s21  ;;  %p448_p2 = scmp.lt.u32.totalorder %s440_s21, %s683_s17 }
  0x66   : > { %p442_p1 = pnand %p441_p12, %p743_p3 }
  0x67   : > { %p447_p11 = por %p446_p9, %p445_p6 }
  0x68   : > { %p443_p4 = pneg %p442_p1 }
  0x69   : > { %p449_p5 = por %p448_p2, %p447_p11 }
  0x6b   : > { %p450_p8 = pnand %p449_p5, %p443_p4 }
  0x6d   : > { %453 = shalt.err (!%p450_p8)
}
  0x6e   : > { %s518_s7 = smov 128   ;;  %s519_s8 = smov 8  }
  0x6f   : > { %308 = dma.vmem_to_hbm [thread:$0]  (%p743_p3), %s678_s9, 256, %s683_s17, %s187_s20, %s518_s7, %s518_s7, %s519_s8  }
  0x70 PF: > { %s216_s10 = sand.u32 1, %s490_s0   ;;  %p744_p0 = scmp.ne.s32.totalorder %s740_s13, 0 }
  0x71   : > { %p745_p7 = scmp.ge.s32.totalorder %s510_s30, 2  ;;  %s217_s14 = scalar_lea.sflag [#allocation7], %s216_s10 }
  0x73   : > { %p315_p10 = pnand %p745_p7, %p744_p0 }
  0x75   : > { %485 = dma.done.wait (!%p315_p10), %s217_s14, 256  }
  0x76   : > { %487 = vsyncadd (!%p315_p10), %s217_s14, 4294967040  ;;  %s27_s30 = sadd.s32 1, %s510_s30   ;;  %s746_s0 = smov %s494_s1 }
  0x77   : > { %p24_p13 = scmp.ge.s32.totalorder %s27_s30, 4   ;;  %s747_s1 = smov %s498_s27 }
  0x78   : > { %s748_s27 = smov %s611_s12  ;;  %s749_s28 = smov %s506_s29 }
  0x79   : > { %s750_s29 = smov %s752_s6  ;;  %26 = sbr.rel (!%p24_p13) target bundleno = 28 (0x1c), region = 71 }
  0x80   :  { %222 = vsyncpa [#allocation6], 1 }
  0x81   :  { %224 = vsyncpa [#allocation6 + $0x1], 1 }
  0x82   :  { %225 = vsyncpa [#allocation7], 1 }
  0x83   :  { %227 = vsyncpa [#allocation7 + $0x1], 1 }

</bundles_post_ra>
